<compile_context>
chip_gen: v6e
topology: v6e:2x2x1
jax: 0.10.0
libtpu: 0.0.40
codegen_flags: <defaults>
</compile_context>

<pallas_src>
import functools
import math

import jax
import jax.numpy as jnp
from jax.experimental import pallas as pl
from jax.experimental.pallas import tpu as pltpu


# ---------------------------------------------------------------------------
# Tiling helpers
# ---------------------------------------------------------------------------
_ENC_TILE_BYTES = 2 * 1024 * 1024   # per encoder tile; Pallas double-buffers it


def _pick_batch_tile(B):
    # Second-to-last dim of the enc / out blocks: multiple of 8, or full B.
    if B > 8 and B % 8 == 0:
        return 8
    return B


def _pick_seq_tile(S, tb, H, itemsize):
    cap = max(1, _ENC_TILE_BYTES // max(1, tb * H * itemsize))
    if S <= cap:
        return S
    best = 1
    for d in range(cap, 0, -1):
        if S % d == 0:
            if d % 8 == 0:          # aligned sublane stores into score scratch
                return d
            best = max(best, d)
    return best


# ---------------------------------------------------------------------------
# In-kernel helpers
# ---------------------------------------------------------------------------
def _softmax_last(x):
    m = jnp.max(x, axis=-1, keepdims=True)
    e = jnp.exp(x - m)
    # Approximate reciprocal lowers to the EUP vrcp slot (co-issues for free).
    return e * pl.reciprocal(jnp.sum(e, axis=-1, keepdims=True), approx=True)


def _accumulate_and_finalize(sc, scr_ref, out_ref, *, ts, ns):
    """Store this seq tile's (ts, tb) raw scores; softmax + emit on last tile."""
    si = pl.program_id(1)
    if ns == 1:                     # single seq tile: static full store
        scr_ref[...] = sc
    else:
        start = si * ts
        if ts % 8 == 0:
            start = pl.multiple_of(start, 8)
        scr_ref[pl.ds(start, ts), :] = sc

    @pl.when(si == ns - 1)
    def _():
        scores = jnp.transpose(scr_ref[...])            # (tb, S), lane-dense S
        out_ref[:, 0, :] = _softmax_last(scores).astype(out_ref.dtype)


# ---------------------------------------------------------------------------
# Kernels
# ---------------------------------------------------------------------------
def _dot_kernel(hid_ref, enc_ref, out_ref, scr_ref, *, ts, ns):
    h = hid_ref[0].astype(jnp.float32)                          # (tb, H)
    sc = jnp.sum(enc_ref[...].astype(jnp.float32) * h[None, :, :], axis=-1)
    _accumulate_and_finalize(sc, scr_ref, out_ref, ts=ts, ns=ns)


def _general_kernel(hid_ref, enc_ref, w_ref, out_ref, scr_ref, hp_ref, *, ts, ns):
    @pl.when(pl.program_id(1) == 0)
    def _():
        # Fold: h' = hidden @ W (PyTorch (out,in) weight layout). The bias
        # contributes hidden·b, constant over seq -> cancels in the softmax.
        hp_ref[...] = jnp.dot(hid_ref[0], w_ref[...],
                              preferred_element_type=jnp.float32)
    sc = jnp.sum(enc_ref[...].astype(jnp.float32) * hp_ref[...][None, :, :],
                 axis=-1)                                       # (ts, tb)
    _accumulate_and_finalize(sc, scr_ref, out_ref, ts=ts, ns=ns)


def _concat_kernel(hid_ref, enc_ref, w1_ref, w2_ref, b_ref, v_ref,
                   out_ref, scr_ref, hp_ref, *, ts, ns):
    @pl.when(pl.program_id(1) == 0)
    def _():
        hp_ref[...] = (
            jnp.einsum("bh,kh->bk", hid_ref[0], w1_ref[...],
                       preferred_element_type=jnp.float32)
            + b_ref[...].astype(jnp.float32))                   # (tb, H)
    # Per-tile energy only: (ts, tb, H) f32 — never the full (B, S, H).
    e_part = jnp.einsum("sbh,kh->sbk", enc_ref[...], w2_ref[...],
                        preferred_element_type=jnp.float32)
    energy = jnp.tanh(e_part + hp_ref[...][None, :, :])
    v = v_ref[...].astype(jnp.float32)                          # (1, H)
    sc = jnp.sum(energy * v[None, :, :], axis=-1)               # (ts, tb)
    _accumulate_and_finalize(sc, scr_ref, out_ref, ts=ts, ns=ns)


# ---------------------------------------------------------------------------
# Module wrapper
# ---------------------------------------------------------------------------
class AttnPallas:
    """Pallas TPU port of the PyTorch `Attn` module (forward semantics)."""

    def __init__(self, method, hidden_size, key):
        if method not in ("dot", "general", "concat"):
            raise ValueError(method, "is not an appropriate attention method")
        self.method = method
        self.hidden_size = hidden_size
        H = hidden_size
        k_w, k_b, k_v = jax.random.split(key, 3)
        if method == "general":
            bound = 1.0 / math.sqrt(H)
            self.w = jax.random.uniform(k_w, (H, H), jnp.float32, -bound, bound)
            self.b = jax.random.uniform(k_b, (1, H), jnp.float32, -bound, bound)
        elif method == "concat":
            bound = 1.0 / math.sqrt(2 * H)
            self.w = jax.random.uniform(k_w, (H, 2 * H), jnp.float32, -bound, bound)
            self.b = jax.random.uniform(k_b, (1, H), jnp.float32, -bound, bound)
            # PyTorch's nn.Parameter(torch.FloatTensor(H)) is uninitialized
            # memory; initialize deterministically here instead.
            self.v = jax.random.uniform(k_v, (1, H), jnp.float32, -1.0, 1.0)
            # One-time host-side split of W into the half acting on the
            # decoder state (w1) and the half acting on the encoder (w2).
            self.w1 = self.w[:, :H]
            self.w2 = self.w[:, H:]

    def __call__(self, hidden, encoder_outputs):
        S, B, H = encoder_outputs.shape
        tb = _pick_batch_tile(B)
        ts = _pick_seq_tile(S, tb, H, jnp.dtype(encoder_outputs.dtype).itemsize)
        nb, ns = B // tb, S // ts

        hid_spec = pl.BlockSpec((1, tb, H), lambda bi, si: (0, bi, 0))
        enc_spec = pl.BlockSpec((ts, tb, H), lambda bi, si: (si, bi, 0))
        out_spec = pl.BlockSpec((tb, 1, S), lambda bi, si: (bi, 0, 0))
        const2d = lambda bi, si: (0, 0)

        scratch = [pltpu.VMEM((S, tb), jnp.float32)]            # raw score rows
        if self.method == "dot":
            kernel = functools.partial(_dot_kernel, ts=ts, ns=ns)
            in_specs = [hid_spec, enc_spec]
            operands = (hidden, encoder_outputs)
        elif self.method == "general":
            kernel = functools.partial(_general_kernel, ts=ts, ns=ns)
            in_specs = [hid_spec, enc_spec, pl.BlockSpec((H, H), const2d)]
            operands = (hidden, encoder_outputs, self.w)
            scratch.append(pltpu.VMEM((tb, H), jnp.float32))    # folded hidden@W
        else:  # concat
            kernel = functools.partial(_concat_kernel, ts=ts, ns=ns)
            in_specs = [hid_spec, enc_spec,
                        pl.BlockSpec((H, H), const2d),
                        pl.BlockSpec((H, H), const2d),
                        pl.BlockSpec((1, H), const2d),
                        pl.BlockSpec((1, H), const2d)]
            operands = (hidden, encoder_outputs, self.w1, self.w2, self.b, self.v)
            scratch.append(pltpu.VMEM((tb, H), jnp.float32))    # hidden@W1 + b

        return pl.pallas_call(
            kernel,
            out_shape=jax.ShapeDtypeStruct((B, 1, S), jnp.float32),
            grid_spec=pltpu.PrefetchScalarGridSpec(
                num_scalar_prefetch=0,
                grid=(nb, ns),
                in_specs=in_specs,
                out_specs=out_spec,
                scratch_shapes=scratch),
            compiler_params=pltpu.CompilerParams(
                dimension_semantics=("parallel", "arbitrary"),
                vmem_limit_bytes=32 * 1024 * 1024),
        )(*operands)


# ---------------------------------------------------------------------------
# Pure-JAX reference (mirrors the PyTorch forward exactly) for verification
# ---------------------------------------------------------------------------
def _reference(attn, hidden, encoder_outputs):
    if attn.method == "dot":
        energies = jnp.sum(hidden * encoder_outputs, axis=2)          # (S, B)
    elif attn.method == "general":
        energy = jnp.einsum("sbh,kh->sbk", encoder_outputs, attn.w) + attn.b[0]
        energies = jnp.sum(hidden * energy, axis=2)
    else:
        S = encoder_outputs.shape[0]
        h_exp = jnp.broadcast_to(hidden, (S,) + hidden.shape[1:])
        cat = jnp.concatenate([h_exp, encoder_outputs], axis=2)       # (S, B, 2H)
        energy = jnp.tanh(jnp.einsum("sbh,kh->sbk", cat, attn.w) + attn.b[0])
        energies = jnp.sum(attn.v[0] * energy, axis=2)
    energies = energies.T                                             # (B, S)
    return jax.nn.softmax(energies, axis=1)[:, None, :]               # (B, 1, S)


# ---------------------------------------------------------------------------
if __name__ == "__main__":
    hidden_size = 32
    batch = 2
    seq = 8

    key = jax.random.PRNGKey(0)
    k_h, k_e, k_p1, k_p2, k_p3 = jax.random.split(key, 5)

    hidden = jax.random.normal(k_h, (1, batch, hidden_size), jnp.float32)
    encoder_outputs = jax.random.normal(k_e, (seq, batch, hidden_size), jnp.float32)

    param_keys = {"dot": k_p1, "general": k_p2, "concat": k_p3}
    for method in ("dot", "general", "concat"):
        attn = AttnPallas(method, hidden_size, param_keys[method])
        out = jax.block_until_ready(attn(hidden, encoder_outputs))
        ref = _reference(attn, hidden, encoder_outputs)
        assert out.shape == (batch, 1, seq), (method, out.shape)
        # Tolerance loosened vs. 1e-5 (per the perf review): the softmax
        # denominator uses the approximate EUP reciprocal, and 'general'
        # drops the softmax-invariant bias term.
        assert jnp.allclose(out, ref, atol=1e-2, rtol=1e-2), (
            f"mismatch for method={method}")

    print("KERNEL_OK")
</pallas_src>

<mosaic_0001>
module attributes {stable_mosaic.version = 11 : i64} {
  func.func @_dot_kernel(%arg0: i32, %arg1: i32, %arg2: memref<1x2x32xf32, #tpu.memory_space<vmem>>, %arg3: memref<8x2x32xf32, #tpu.memory_space<vmem>>, %arg4: memref<2x1x8xf32, #tpu.memory_space<vmem>>, %arg5: memref<8x2xf32, #tpu.memory_space<vmem>>) attributes {dimension_semantics = [#tpu.dimension_semantics<parallel>, #tpu.dimension_semantics<arbitrary>], iteration_bounds = array<i64: 1, 1>, scalar_prefetch = 0 : i64, scratch_operands = 1 : i64, tpu.core_type = #tpu.core_type<tc>, window_params = [{transform_indices = @transform_0, window_bounds = array<i64: 1, 2, 32>}, {transform_indices = @transform_1, window_bounds = array<i64: 8, 2, 32>}, {transform_indices = @transform_2, window_bounds = array<i64: 2, 1, 8>}]} {
    %c0 = arith.constant 0 : index
    %c0_0 = arith.constant 0 : index
    %c0_1 = arith.constant 0 : index
    %0 = vector.load %arg2[%c0, %c0_0, %c0_1] : memref<1x2x32xf32, #tpu.memory_space<vmem>>, vector<1x2x32xf32>
    %1 = vector.shape_cast %0 : vector<1x2x32xf32> to vector<2x32xf32>
    %c0_2 = arith.constant 0 : index
    %c0_3 = arith.constant 0 : index
    %c0_4 = arith.constant 0 : index
    %2 = vector.load %arg3[%c0_2, %c0_3, %c0_4] : memref<8x2x32xf32, #tpu.memory_space<vmem>>, vector<8x2x32xf32>
    %3 = vector.shape_cast %1 : vector<2x32xf32> to vector<1x2x32xf32>
    %4 = vector.broadcast %3 : vector<1x2x32xf32> to vector<8x2x32xf32>
    %5 = arith.mulf %2, %4 : vector<8x2x32xf32>
    %cst = arith.constant dense<0.000000e+00> : vector<8x2xf32>
    %6 = vector.multi_reduction <add>, %5, %cst [2] : vector<8x2x32xf32> to vector<8x2xf32>
    %c0_5 = arith.constant 0 : index
    %c0_6 = arith.constant 0 : index
    %7 = vector.load %arg5[%c0_5, %c0_6] : memref<8x2xf32, #tpu.memory_space<vmem>>, vector<8x2xf32>
    tpu.vector_store %arg5[%c0_5, %c0_6], %6 {strides = array<i32>} : memref<8x2xf32, #tpu.memory_space<vmem>>, vector<8x2xf32>,
    %c0_i32 = arith.constant 0 : i32
    %8 = arith.cmpi eq, %arg1, %c0_i32 : i32
    %9 = arith.extui %8 : i1 to i32
    %c0_i32_7 = arith.constant 0 : i32
    %10 = arith.cmpi ne, %9, %c0_i32_7 : i32
    scf.if %10 {
      %c0_8 = arith.constant 0 : index
      %c0_9 = arith.constant 0 : index
      %11 = vector.load %arg5[%c0_8, %c0_9] : memref<8x2xf32, #tpu.memory_space<vmem>>, vector<8x2xf32>
      %12 = tpu.transpose %11, [1, 0] : vector<8x2xf32> -> vector<2x8xf32>
      %cst_10 = arith.constant dense<0xFF800000> : vector<2xf32>
      %13 = vector.multi_reduction <maximumf>, %12, %cst_10 [1] : vector<2x8xf32> to vector<2xf32>
      %14 = vector.shape_cast %13 : vector<2xf32> to vector<2x1xf32>
      %15 = vector.broadcast %14 : vector<2x1xf32> to vector<2x8xf32>
      %16 = arith.subf %12, %15 : vector<2x8xf32>
      %17 = math.exp %16 : vector<2x8xf32>
      %cst_11 = arith.constant dense<0.000000e+00> : vector<2xf32>
      %18 = vector.multi_reduction <add>, %17, %cst_11 [1] : vector<2x8xf32> to vector<2xf32>
      %19 = vector.shape_cast %18 : vector<2xf32> to vector<2x1xf32>
      %20 = tpu.reciprocal %19 {approx = true} : vector<2x1xf32> -> vector<2x1xf32>
      %21 = vector.broadcast %20 : vector<2x1xf32> to vector<2x8xf32>
      %22 = arith.mulf %17, %21 : vector<2x8xf32>
      %c0_12 = arith.constant 0 : index
      %c0_13 = arith.constant 0 : index
      %c0_14 = arith.constant 0 : index
      %23 = vector.load %arg4[%c0_12, %c0_13, %c0_14] : memref<2x1x8xf32, #tpu.memory_space<vmem>>, vector<2x1x8xf32>
      %24 = vector.shape_cast %23 : vector<2x1x8xf32> to vector<2x8xf32>
      %25 = vector.shape_cast %22 : vector<2x8xf32> to vector<2x1x8xf32>
      tpu.vector_store %arg4[%c0_12, %c0_13, %c0_14], %25 {strides = array<i32>} : memref<2x1x8xf32, #tpu.memory_space<vmem>>, vector<2x1x8xf32>,
    } else {
    }
    return
  }
  func.func @transform_0(%arg0: i32, %arg1: i32) -> (i32, i32, i32) {
    %c0_i32 = arith.constant 0 : i32
    %c0_i32_0 = arith.constant 0 : i32
    %c0_i32_1 = arith.constant 0 : i32
    return %c0_i32, %arg0, %c0_i32_0 : i32, i32, i32
  }
  func.func @transform_1(%arg0: i32, %arg1: i32) -> (i32, i32, i32) {
    %c0_i32 = arith.constant 0 : i32
    %c0_i32_0 = arith.constant 0 : i32
    return %arg1, %arg0, %c0_i32 : i32, i32, i32
  }
  func.func @transform_2(%arg0: i32, %arg1: i32) -> (i32, i32, i32) {
    %c0_i32 = arith.constant 0 : i32
    %c0_i32_0 = arith.constant 0 : i32
    %c0_i32_1 = arith.constant 0 : i32
    return %arg0, %c0_i32, %c0_i32_0 : i32, i32, i32
  }
}

</mosaic_0001>

<bundles_post_ra>
// kernel: tpu_custom_call.1
= control target key start
LH: loop header
LB: loop body
LE: loop exit
PB: predicated region body
PF: predicated region fallthrough
CT: control target
= control target key end

     0   :  { %7 = vsyncpa [#allocation4], 0  ;;  %s353_s0 = inlined_call_operand.hbm [shape: f32[1,2,32], index: 0, kind: input, shape index: {}]   ;;  %s354_s1 = inlined_call_operand.hbm [shape: f32[8,2,32], index: 1, kind: input, shape index: {}]   ;;  %s355_s2 = inlined_call_operand.hbm [shape: f32[2,1,8], index: 2, kind: output, shape index: {}]  }
   0x1   :  { %8 = vsyncpa [#allocation7], 0 }
   0x2   :  { %9 = vsyncpa [#allocation5], 0  ;;  %s313_s9 = smov [#allocation3]   ;;  %s314_s11 = smov [#allocation6]  }
   0x3   :  { %s16_s10 = sshll.u32 %s313_s9, 4  ;;  %s25_s12 = sshll.u32 %s314_s11, 4  ;;  %s17_s10 = int_to_ptr.vmem [resolvable:$true] %s16_s10  ;;  %s26_s12 = int_to_ptr.vmem [resolvable:$true] %s25_s12 }
   0x4   :  { %s255_s13 = scalar_lea.vmem %s17_s10, 32  ;;  %p260_p1 = scmp.lt.s32.totalorder %s17_s10, %s17_s10 }
   0x5   :  { %p256_p0 = scmp.ne.s32.totalorder %s17_s10, %s255_s13  ;;  %p261_p2 = scmp.lt.s32.totalorder %s255_s13, %s255_s13 }
   0x7   :  { %p262_p3 = por %p261_p2, %p260_p1 }
   0x9   :  { %p263_p4 = pnand %p262_p3, %p256_p0 }
   0xb   :  { %266 = shalt.err (!%p263_p4)
}
   0xc   :  { %19 = dma.hbm_to_vmem [thread:$0]  %s353_s0, 32, %s17_s10, [#allocation4]  }
   0xd   :  { %s275_s16 = scalar_lea.vmem %s26_s12, 256  ;;  %p280_p6 = scmp.lt.s32.totalorder %s26_s12, %s26_s12 }
   0xe   :  { %p276_p5 = scmp.ne.s32.totalorder %s26_s12, %s275_s16  ;;  %p281_p7 = scmp.lt.s32.totalorder %s275_s16, %s275_s16 }
  0x10   :  { %p282_p8 = por %p281_p7, %p280_p6 }
  0x12   :  { %p283_p9 = pnand %p282_p8, %p276_p5 }
  0x14   :  { %286 = shalt.err (!%p283_p9)
}
  0x15   :  { %s315_s17 = smov 32   ;;  %s316_s18 = smov 2  }
  0x16   :  { %31 = dma.hbm_to_vmem [thread:$0]  %s354_s1, 256, %s26_s12, [#allocation7], %s315_s17, %s315_s17, %s316_s18  }
  0x17   :  { %307 = dma.done.wait [#allocation4], 32  }
  0x18   :  { %308 = vsyncadd [#allocation4], 4294967264 }
  0x19   :  { %309 = dma.done.wait [#allocation7], 256  }
  0x1a   :  { %310 = vsyncadd [#allocation7], 4294967040  ;;  %vm55_vm0 = vcmask 254976   ;;  %v38_v0 = vld [vmem:[#allocation3] sm:$0x3]  ;;  %v88_v25 = vlaneseq  ;;  %vm122_vm1 = vcmask 1041409  }
  0x1b   :  { %v39_v1 = vld [vmem:[#allocation6] sm:$0x3]  ;;  %v41_v2 = vld [vmem:[#allocation6 + $0x4] sm:$0x3]  ;;  %v40_v5 = vld [vmem:[#allocation6 + $0x2] sm:$0x3] }
  0x1c   :  { %v47_v3 = vmul.f32 %v39_v1, %v38_v0  ;;  %v49_v4 = vmul.f32 %v41_v2, %v38_v0  ;;  %v42_v6 = vld [vmem:[#allocation6 + $0x6] sm:$0x3]  ;;  %v48_v7 = vmul.f32 %v40_v5, %v38_v0  ;;  %v43_v9 = vld [vmem:[#allocation6 + $0x8] sm:$0x3]  ;;  %v44_v10 = vld [vmem:[#allocation6 + $0xa] sm:$0x3] }
  0x1d   :  { %v50_v8 = vmul.f32 %v42_v6, %v38_v0  ;;  %v51_v15 = vmul.f32 %v43_v9, %v38_v0  ;;  %v52_v16 = vmul.f32 %v44_v10, %v38_v0  ;;  %v45_v17 = vld [vmem:[#allocation6 + $0xc] sm:$0x3]  ;;  %v46_v18 = vld [vmem:[#allocation6 + $0xe] sm:$0x3]  ;;  %v89_v26 = vand.u32 127, %v88_v25  ;;  %s318_s0 = smov [#allocation8]  }
  0x1e   :  { %v56_v11 = vsel %vm55_vm0, %v47_v3, 0.0  ;;  %v62_v12 = vsel %vm55_vm0, %v49_v4, 0.0  ;;  %v59_v13 = vsel %vm55_vm0, %v48_v7, 0.0  ;;  %v53_v21 = vmul.f32 %v45_v17, %v38_v0  ;;  %s221_s1 = sshll.u32 %s318_s0, 4  ;;  %s222_s1 = int_to_ptr.vmem [resolvable:$true] %s221_s1 }
  0x1f   :  { %57 = vadd.xlane.f32.xlu0 %v56_v11  ;;  %63 = vadd.xlane.f32.xlu1 %v62_v12  ;;  %v65_v14 = vsel %vm55_vm0, %v50_v8, 0.0  ;;  %v68_v19 = vsel %vm55_vm0, %v51_v15, 0.0  ;;  %v71_v20 = vsel %vm55_vm0, %v52_v16, 0.0  ;;  %v54_v22 = vmul.f32 %v46_v18, %v38_v0  ;;  %s287_s21 = scalar_lea.vmem %s222_s1, 32  ;;  %p292_p11 = scmp.lt.s32.totalorder %s222_s1, %s222_s1 }
  0x20   :  { %v74_v23 = vsel %vm55_vm0, %v53_v21, 0.0  ;;  %v91_v27 = vshrl.u32 %v88_v25, 7  ;;  %vm124_vm2 = vcmask 1042434   ;;  %vm126_vm3 = vcmask 1043459   ;;  %p288_p10 = scmp.ne.s32.totalorder %s222_s1, %s287_s21  ;;  %p293_p12 = scmp.lt.s32.totalorder %s287_s21, %s287_s21 }
  0x21   :  { %v77_v24 = vsel %vm55_vm0, %v54_v22, 0.0  ;;  %vm128_vm4 = vcmask 1044484   ;;  %vm130_vm5 = vcmask 1045509   ;;  %vm132_vm6 = vcmask 1046534  }
  0x22   :  { %v92_v30 = vsub.s32 %v89_v26, %v91_v27  ;;  %vm134_vm7 = vcmask 1047559   ;;  %vm137_vm8 = vcmask 15360   ;;  %vm176_vm9 = vcmask 58368   ;;  %p294_p13 = por %p293_p12, %p292_p11 }
  0x23   :  { %60 = vadd.xlane.f32.xlu0 %v59_v13  ;;  %66 = vadd.xlane.f32.xlu1 %v65_v14  ;;  %v317_v61 = vmov 1966171168   ;;  %vm213_vm10 = vcmask 57344  }
  0x24   :  { %v190_v62 = vunpack.c.l.s4 %v317_v61  ;;  %p295_p0 = pnand %p294_p13, %p288_p10 }
  0x26   :  { %v191_v63 = vunpack.c.0.s8 %v190_v62 }
  0x27   :  { %69 = vadd.xlane.f32.xlu0 %v68_v19  ;;  %72 = vadd.xlane.f32.xlu1 %v71_v20 }
  0x28   :  { %v194_v0 = vsub.s32 %v191_v63, %v91_v27 }
  0x2b   :  { %75 = vadd.xlane.f32.xlu0 %v74_v23  ;;  %78 = vadd.xlane.f32.xlu1 %v77_v24 }
  0xa8   :  { %v58_v28 = vpop.xlane.xlu0 %57  ;;  %v64_v29 = vpop.xlane.xlu1 %63 }
  0xa9   :  { %v93_v33 = vrot.slane %v58_v28, %v92_v30  ;;  %v101_v36 = vrot.slane %v64_v29, %v92_v30 }
  0xac   :  { %v61_v31 = vpop.xlane.xlu0 %60  ;;  %v67_v32 = vpop.xlane.xlu1 %66 }
  0xad   :  { %v97_v34 = vrot.slane %v61_v31, %v92_v30  ;;  %v105_v35 = vrot.slane %v67_v32, %v92_v30 }
  0xaf   :  { %v123_v37 = vsel %vm122_vm1, %v97_v34, %v93_v33 }
  0xb0   :  { %v125_v38 = vsel %vm124_vm2, %v101_v36, %v123_v37  ;;  %v70_v39 = vpop.xlane.xlu0 %69  ;;  %v73_v40 = vpop.xlane.xlu1 %72 }
  0xb1   :  { %v127_v41 = vsel %vm126_vm3, %v105_v35, %v125_v38  ;;  %v109_v42 = vrot.slane %v70_v39, %v92_v30  ;;  %v113_v43 = vrot.slane %v73_v40, %v92_v30 }
  0xb3   :  { %v129_v44 = vsel %vm128_vm4, %v109_v42, %v127_v41 }
  0xb4   :  { %v76_v45 = vpop.xlane.xlu0 %75  ;;  %v79_v46 = vpop.xlane.xlu1 %78  ;;  %v131_v49 = vsel %vm130_vm5, %v113_v43, %v129_v44 }
  0xb5   :  { %v117_v47 = vrot.slane %v76_v45, %v92_v30  ;;  %v121_v48 = vrot.slane %v79_v46, %v92_v30 }
  0xb7   :  { %v133_v50 = vsel %vm132_vm6, %v117_v47, %v131_v49 }
  0xb8   :  { %v135_v51 = vsel %vm134_vm7, %v121_v48, %v133_v50 }
  0xb9   :  { %138 = vst.msk [vmem:[#allocation2] sm:$0xff] %vm137_vm8, %v135_v51 }
  0xc0   :  { %v143_v52 = vld [vmem:[#allocation2] sm:$0xff] }
  0xc1   :  { %144 = vxpose.xlu0.b32.start.end [1/1] (short) (narrow) %v143_v52, 8 }
 0x13d   :  { %v160_v53 = vpop.trf.xlu0 }
 0x13e   :  { %v177_v54 = vsel %vm176_vm9, %v160_v53, -inf }
 0x13f   :  { %178 = vmax.xlane.f32.xlu1 %v177_v54 }
 0x1c8   :  { %v179_v55 = vpop.xlane.xlu1 %178 }
 0x1c9   :  { %v180_v56 = vsub.f32 %v160_v53, %v179_v55 }
 0x1cb   :  { %v181_v57 = vmul.f32 1.442695, %v180_v56 }
 0x1cd   :  { %243 = vpow2.f32 %v181_v57 }
 0x1da   :  { %v244_v58 = vpop.eup %243 }
 0x1db   :  { %v183_v59 = vsel %vm176_vm9, %v244_v58, 0.0 }
 0x1dc   :  { %184 = vadd.xlane.f32.xlu1 %v183_v59 }
 0x265   :  { %v185_v60 = vpop.xlane.xlu1 %184 }
 0x266   :  { %245 = vrcp.f32 %v185_v60 }
 0x273   :  { %v246_v1 = vpop.eup %245 }
 0x274   :  { %v187_v2 = vmul.f32 %v246_v1, %v244_v58 }
 0x276   :  { %v195_v3 = vrot.slane %v187_v2, %v194_v0 }
 0x278   :  { %v196_v4 = vcombine.high %v195_v3, %v195_v3  ;;  %v203_v5 = vrot.slane %v195_v3, %v194_v0 }
 0x27a   :  { %v210_v6 = vrot.slane %v196_v4, %v194_v0  ;;  %214 = vst.msk [vmem:[#allocation8] sm:$0x1] %vm213_vm10, %v203_v5 }
 0x27c   :  { %215 = vst.msk [vmem:[#allocation8 + $0x1] sm:$0x1] %vm213_vm10, %v210_v6 }
 0x27d   :  { %298 = shalt.err (!%p295_p0)
}
 0x27e   :  { %s319_s22 = smov 16   ;;  %s320_s23 = smov 1  }
 0x27f   :  { %227 = dma.vmem_to_hbm [thread:$0]  %s222_s1, 32, %s355_s2, [#allocation5], %s319_s22, %s319_s22, %s320_s23  }
 0x280   :  { %311 = dma.done.wait [#allocation5], 32  }
 0x281   :  { %312 = vsyncadd [#allocation5], 4294967264 }
 0x282   :  { %231 = vsyncpa [#allocation4], 1 }
 0x283   :  { %232 = vsyncpa [#allocation7], 1 }
 0x284   :  { %233 = vsyncpa [#allocation5], 1 }

</bundles_post_ra>
